<compile_context>
chip_gen: v6e
topology: v6e:2x2x1
jax: 0.10.0
libtpu: 0.0.40
codegen_flags: <defaults>
</compile_context>

<pallas_src>
import functools

import jax
import jax.numpy as jnp
from jax import lax
from jax.experimental import pallas as pl
from jax.experimental.pallas import tpu as pltpu


# ------------------------------ Pallas kernel -------------------------------

def _linear_act_kernel(x_ref, w_ref, b_ref, o_ref, *, n_valid, use_sigmoid):
    # x_ref: (tm, Kp)   w_ref: (Kp, Np)   b_ref: (1, Np)   o_ref: (tm, Np)
    logits = jnp.dot(x_ref[...], w_ref[...],
                     preferred_element_type=jnp.float32)
    logits = logits + b_ref[...]                      # f32 epilogue

    col = lax.broadcasted_iota(jnp.int32, logits.shape, dimension=1)
    valid = col < n_valid                             # mask padded action lanes

    if use_sigmoid:
        probs = 1.0 / (1.0 + jnp.exp(-logits))
        probs = jnp.where(valid, probs, 0.0)
    else:
        masked = jnp.where(valid, logits, -1e30)
        m = jnp.max(masked, axis=-1, keepdims=True)
        e = jnp.exp(masked - m)
        e = jnp.where(valid, e, 0.0)
        denom = jnp.sum(e, axis=-1, keepdims=True)
        probs = e / denom

    o_ref[...] = probs.astype(o_ref.dtype)


# -------------------------------- wrapper ------------------------------------

def _round_up(x, m):
    return (x + m - 1) // m * m


def _pick_tm(batch, kp, np_, itemsize, vmem_budget=24 * 1024 * 1024):
    """Largest batch tile (multiple of 8) whose live VMEM fits the budget."""
    b8 = _round_up(batch, 8)
    for t in (512, 256, 128, 64, 32, 16, 8):
        if t > b8:
            continue
        live = (2 * t * kp * itemsize          # x tile, double-buffered
                + 2 * t * np_ * 4              # out tile (f32), double-buffered
                + kp * np_ * itemsize          # resident weight
                + 2 * np_ * 4)                 # bias
        if live <= vmem_budget:
            return t
    return 8


def softmax_linear_forward(state, weight, bias, num_actions,
                           compute_dtype=jnp.float32):
    """state: (B, num_inputs) f32; weight: (num_actions, num_inputs); bias: (num_actions,)."""
    B, K = state.shape
    N = num_actions
    itemsize = jnp.dtype(compute_dtype).itemsize

    Kp = _round_up(K, 128)          # aligned contraction depth
    Np = _round_up(N, 128)          # lane-dense output width
    tm = _pick_tm(B, Kp, Np, itemsize)
    Mp = _round_up(B, tm)

    xp = jnp.zeros((Mp, Kp), compute_dtype).at[:B, :K].set(
        state.astype(compute_dtype))
    wp = jnp.zeros((Kp, Np), compute_dtype).at[:K, :N].set(
        weight.T.astype(compute_dtype))
    bp = jnp.zeros((1, Np), jnp.float32).at[0, :N].set(
        bias.astype(jnp.float32))

    kernel = functools.partial(_linear_act_kernel,
                               n_valid=N, use_sigmoid=(N == 1))

    out = pl.pallas_call(
        kernel,
        out_shape=jax.ShapeDtypeStruct((Mp, Np), jnp.float32),
        grid=(Mp // tm,),
        in_specs=[
            pl.BlockSpec((tm, Kp), lambda i: (i, 0)),   # activations tile
            pl.BlockSpec((Kp, Np), lambda i: (0, 0)),   # resident weight
            pl.BlockSpec((1, Np), lambda i: (0, 0)),    # resident bias
        ],
        out_specs=pl.BlockSpec((tm, Np), lambda i: (i, 0)),
        compiler_params=pltpu.CompilerParams(
            dimension_semantics=("parallel",)),
        cost_estimate=pl.CostEstimate(
            flops=2 * Mp * Kp * Np,
            transcendentals=Mp * Np,
            bytes_accessed=(Mp * Kp + Kp * Np) * itemsize + Mp * Np * 4),
    )(xp, wp, bp)

    probs = out[:B, :N]
    if N == 1:
        probs = probs.reshape(-1)
    return probs


# ---------------------------- pure-JAX reference -----------------------------

def reference_forward(state, weight, bias, num_actions):
    logits = state @ weight.T + bias
    if num_actions == 1:
        return jax.nn.sigmoid(logits).reshape(-1)
    return jax.nn.softmax(logits, axis=1)


# ---------------------- deterministic parameter creation ---------------------

def init_linear(key, num_inputs, num_actions):
    kw, kb = jax.random.split(key)
    bound = 1.0 / jnp.sqrt(jnp.float32(num_inputs))
    w = jax.random.uniform(kw, (num_actions, num_inputs), jnp.float32,
                           -bound, bound)
    b = jax.random.uniform(kb, (num_actions,), jnp.float32, -bound, bound)
    return w, b


# ----------------------------------- main ------------------------------------

if __name__ == "__main__":
    key = jax.random.PRNGKey(0)
    kx, kp1, kp2 = jax.random.split(key, 3)

    batch, num_inputs = 8, 32
    state = jax.random.normal(kx, (batch, num_inputs), jnp.float32)

    # Case 1: multi-action head -> softmax over actions.
    num_actions = 4
    w1, b1 = init_linear(kp1, num_inputs, num_actions)
    out1 = jax.block_until_ready(
        softmax_linear_forward(state, w1, b1, num_actions))
    ref1 = reference_forward(state, w1, b1, num_actions)
    assert out1.shape == (batch, num_actions), out1.shape
    assert jnp.allclose(out1, ref1, atol=1e-5, rtol=1e-5), \
        float(jnp.max(jnp.abs(out1 - ref1)))
    assert jnp.allclose(jnp.sum(out1, axis=1), 1.0, atol=1e-5)

    # Case 2: single-action head -> sigmoid, flattened output.
    w2, b2 = init_linear(kp2, num_inputs, 1)
    out2 = jax.block_until_ready(softmax_linear_forward(state, w2, b2, 1))
    ref2 = reference_forward(state, w2, b2, 1)
    assert out2.shape == (batch,), out2.shape
    assert jnp.allclose(out2, ref2, atol=1e-5, rtol=1e-5), \
        float(jnp.max(jnp.abs(out2 - ref2)))

    # Case 3: bf16 operand path (MXU-peak / half-DMA mode), looser tolerance.
    out3 = jax.block_until_ready(
        softmax_linear_forward(state, w1, b1, num_actions,
                               compute_dtype=jnp.bfloat16))
    assert jnp.allclose(out3, ref1, atol=2e-2, rtol=2e-2), \
        float(jnp.max(jnp.abs(out3 - ref1)))

    print("KERNEL_OK")
</pallas_src>

<mosaic_0001>
module attributes {stable_mosaic.version = 11 : i64} {
  func.func @_linear_act_kernel(%arg0: i32, %arg1: memref<8x128xf32, #tpu.memory_space<vmem>>, %arg2: memref<128x128xf32, #tpu.memory_space<vmem>>, %arg3: memref<1x128xf32, #tpu.memory_space<vmem>>, %arg4: memref<8x128xf32, #tpu.memory_space<vmem>>) attributes {dimension_semantics = [#tpu.dimension_semantics<parallel>], iteration_bounds = array<i64: 1>, scalar_prefetch = 0 : i64, scratch_operands = 0 : i64, tpu.core_type = #tpu.core_type<tc>, window_params = [{transform_indices = @transform_0, window_bounds = array<i64: 8, 128>}, {pipeline_mode = #tpu.pipeline_mode<synchronous>, transform_indices = @transform_1, window_bounds = array<i64: 128, 128>}, {pipeline_mode = #tpu.pipeline_mode<synchronous>, transform_indices = @transform_2, window_bounds = array<i64: 1, 128>}, {transform_indices = @transform_3, window_bounds = array<i64: 8, 128>}]} {
    %c0 = arith.constant 0 : index
    %c0_0 = arith.constant 0 : index
    %0 = vector.load %arg1[%c0, %c0_0] : memref<8x128xf32, #tpu.memory_space<vmem>>, vector<8x128xf32>
    %c0_1 = arith.constant 0 : index
    %c0_2 = arith.constant 0 : index
    %1 = vector.load %arg2[%c0_1, %c0_2] : memref<128x128xf32, #tpu.memory_space<vmem>>, vector<128x128xf32>
    %cst = arith.constant dense<0.000000e+00> : vector<8x128xf32>
    %2 = tpu.matmul %0, %1, %cst {dimension_numbers = #tpu.dot_dimension_numbers<[1], [0], [0], [1], [0, 0, 1, 1], [], []>} : vector<8x128xf32>, vector<128x128xf32>, vector<8x128xf32> -> vector<8x128xf32>
    %c0_3 = arith.constant 0 : index
    %c0_4 = arith.constant 0 : index
    %3 = vector.load %arg3[%c0_3, %c0_4] : memref<1x128xf32, #tpu.memory_space<vmem>>, vector<1x128xf32>
    %4 = vector.broadcast %3 : vector<1x128xf32> to vector<8x128xf32>
    %5 = arith.addf %2, %4 : vector<8x128xf32>
    %6 = tpu.iota {dimensions = array<i32: 1>} : vector<8x128xi32>
    %c4_i32 = arith.constant 4 : i32
    %7 = vector.broadcast %c4_i32 : i32 to vector<8x128xi32>
    %8 = arith.cmpi slt, %6, %7 : vector<8x128xi32>
    %cst_5 = arith.constant -1.000000e+30 : f32
    %9 = vector.broadcast %cst_5 : f32 to vector<8x128xf32>
    %10 = arith.select %8, %5, %9 : vector<8x128xi1>, vector<8x128xf32>
    %cst_6 = arith.constant dense<0xFF800000> : vector<8xf32>
    %11 = vector.multi_reduction <maximumf>, %10, %cst_6 [1] : vector<8x128xf32> to vector<8xf32>
    %12 = vector.shape_cast %11 : vector<8xf32> to vector<8x1xf32>
    %13 = vector.broadcast %12 : vector<8x1xf32> to vector<8x128xf32>
    %14 = arith.subf %10, %13 : vector<8x128xf32>
    %15 = math.exp %14 : vector<8x128xf32>
    %cst_7 = arith.constant 0.000000e+00 : f32
    %16 = vector.broadcast %cst_7 : f32 to vector<8x128xf32>
    %17 = arith.select %8, %15, %16 : vector<8x128xi1>, vector<8x128xf32>
    %cst_8 = arith.constant dense<0.000000e+00> : vector<8xf32>
    %18 = vector.multi_reduction <add>, %17, %cst_8 [1] : vector<8x128xf32> to vector<8xf32>
    %19 = vector.shape_cast %18 : vector<8xf32> to vector<8x1xf32>
    %20 = vector.broadcast %19 : vector<8x1xf32> to vector<8x128xf32>
    %21 = arith.divf %17, %20 : vector<8x128xf32>
    %c0_9 = arith.constant 0 : index
    %c0_10 = arith.constant 0 : index
    %22 = vector.load %arg4[%c0_9, %c0_10] : memref<8x128xf32, #tpu.memory_space<vmem>>, vector<8x128xf32>
    tpu.vector_store %arg4[%c0_9, %c0_10], %21 {strides = array<i32>} : memref<8x128xf32, #tpu.memory_space<vmem>>, vector<8x128xf32>,
    return
  }
  func.func @transform_0(%arg0: i32) -> (i32, i32) {
    %c0_i32 = arith.constant 0 : i32
    %c0_i32_0 = arith.constant 0 : i32
    return %arg0, %c0_i32 : i32, i32
  }
  func.func @transform_1(%arg0: i32) -> (i32, i32) {
    %c0_i32 = arith.constant 0 : i32
    %c0_i32_0 = arith.constant 0 : i32
    %c0_i32_1 = arith.constant 0 : i32
    return %c0_i32, %c0_i32_0 : i32, i32
  }
  func.func @transform_2(%arg0: i32) -> (i32, i32) {
    %c0_i32 = arith.constant 0 : i32
    %c0_i32_0 = arith.constant 0 : i32
    %c0_i32_1 = arith.constant 0 : i32
    return %c0_i32, %c0_i32_0 : i32, i32
  }
  func.func @transform_3(%arg0: i32) -> (i32, i32) {
    %c0_i32 = arith.constant 0 : i32
    %c0_i32_0 = arith.constant 0 : i32
    return %arg0, %c0_i32 : i32, i32
  }
}

</mosaic_0001>

<bundles_post_ra>
// kernel: tpu_custom_call.1
= control target key start
LH: loop header
LB: loop body
LE: loop exit
PB: predicated region body
PF: predicated region fallthrough
CT: control target
= control target key end

     0   :  { %8 = vsyncpa [#allocation3], 0  ;;  %s335_s0 = inlined_call_operand.hbm [shape: f32[8,128], index: 0, kind: input, shape index: {}]   ;;  %s336_s1 = inlined_call_operand.hbm [shape: f32[128,128], index: 1, kind: input, shape index: {}]   ;;  %s337_s2 = inlined_call_operand.vmem [shape: f32[1,128], index: 2, kind: input, shape index: {}]   ;;  %s338_s3 = inlined_call_operand.hbm [shape: f32[8,128], index: 3, kind: output, shape index: {}]  }
   0x1   :  { %9 = vsyncpa [#allocation6], 0 }
   0x2   :  { %10 = vsyncpa [#allocation4], 0  ;;  %s296_s12 = smov [#allocation2]   ;;  %s297_s14 = smov [#allocation5]  }
   0x3   :  { %s17_s13 = sshll.u32 %s296_s12, 4  ;;  %s26_s15 = sshll.u32 %s297_s14, 4  ;;  %s18_s13 = int_to_ptr.vmem [resolvable:$true] %s17_s13  ;;  %s27_s15 = int_to_ptr.vmem [resolvable:$true] %s26_s15 }
   0x4   :  { %s238_s16 = scalar_lea.vmem %s18_s13, 128  ;;  %p243_p1 = scmp.lt.s32.totalorder %s18_s13, %s18_s13 }
   0x5   :  { %p239_p0 = scmp.ne.s32.totalorder %s18_s13, %s238_s16  ;;  %p244_p2 = scmp.lt.s32.totalorder %s238_s16, %s238_s16 }
   0x7   :  { %p245_p3 = por %p244_p2, %p243_p1 }
   0x9   :  { %p246_p4 = pnand %p245_p3, %p239_p0 }
   0xb   :  { %249 = shalt.err (!%p246_p4)
}
   0xc   :  { %20 = dma.hbm_to_vmem [thread:$0]  %s335_s0, 128, %s18_s13, [#allocation3]  }
   0xd   :  { %s258_s19 = scalar_lea.vmem %s27_s15, 2048  ;;  %p263_p6 = scmp.lt.s32.totalorder %s27_s15, %s27_s15 }
   0xe   :  { %p259_p5 = scmp.ne.s32.totalorder %s27_s15, %s258_s19  ;;  %p264_p7 = scmp.lt.s32.totalorder %s258_s19, %s258_s19 }
  0x10   :  { %p265_p8 = por %p264_p7, %p263_p6 }
  0x12   :  { %p266_p9 = pnand %p265_p8, %p259_p5 }
  0x14   :  { %269 = shalt.err (!%p266_p9)
}
  0x15   :  { %s298_s20 = smov 128   ;;  %s299_s21 = smov 8  }
  0x16   :  { %32 = dma.hbm_to_vmem [thread:$0]  %s336_s1, 2048, %s27_s15, [#allocation6], %s298_s20, %s298_s20, %s299_s21  }
  0x17   :  { %290 = dma.done.wait [#allocation3], 128  }
  0x18   :  { %291 = vsyncadd [#allocation3], 4294967168 }
  0x19   :  { %292 = dma.done.wait [#allocation6], 2048  }
  0x1a   :  { %293 = vsyncadd [#allocation6], 4294965248  ;;  %v300_v0 = vmov 0.0   ;;  %vm301_vm0 = vmmov 0   ;;  %v57_v1 = vld [vmem:[#allocation5 + $0x78] sm:$0xff]  ;;  %v56_v2 = vld [vmem:[#allocation5 + $0x70] sm:$0xff]  ;;  %v135_v18 = vlaneseq }
  0x1b   :  { %184 = vmatprep.subr.mxu0 %v300_v0  ;;  %216 = vmatprep.mubr.msk.f32.mxu0 %vm301_vm0, %v300_v0  ;;  %v55_v3 = vld [vmem:[#allocation5 + $0x68] sm:$0xff]  ;;  %v54_v4 = vld [vmem:[#allocation5 + $0x60] sm:$0xff]  ;;  %v53_v5 = vld [vmem:[#allocation5 + $0x58] sm:$0xff]  ;;  %s302_s24 = smov [#allocation7]  }
  0x1c   :  { %185 = vmatpush3.msra.mxu0 %v57_v1  ;;  %v52_v6 = vld [vmem:[#allocation5 + $0x50] sm:$0xff]  ;;  %v51_v7 = vld [vmem:[#allocation5 + $0x48] sm:$0xff]  ;;  %v50_v8 = vld [vmem:[#allocation5 + $0x40] sm:$0xff]  ;;  %v136_v19 = vand.u32 127, %v135_v18  ;;  %s156_s25 = sshll.u32 %s302_s24, 4  ;;  %s157_s25 = int_to_ptr.vmem [resolvable:$true] %s156_s25 }
  0x1d   :  { %186 = vmatprep.subr.mxu0 %v300_v0  ;;  %v49_v9 = vld [vmem:[#allocation5 + $0x38] sm:$0xff]  ;;  %v48_v10 = vld [vmem:[#allocation5 + $0x30] sm:$0xff]  ;;  %v47_v11 = vld [vmem:[#allocation5 + $0x28] sm:$0xff]  ;;  %p275_p11 = scmp.lt.s32.totalorder %s157_s25, %s157_s25 }
  0x1e   :  { %187 = vmatpush3.msra.mxu0 %v56_v2  ;;  %v46_v12 = vld [vmem:[#allocation5 + $0x20] sm:$0xff]  ;;  %v45_v13 = vld [vmem:[#allocation5 + $0x18] sm:$0xff]  ;;  %v44_v14 = vld [vmem:[#allocation5 + $0x10] sm:$0xff]  ;;  %vm137_vm1 = vcmp.lt.s32.totalorder %v136_v19, 4 }
  0x1f   :  { %188 = vmatprep.subr.mxu0 %v300_v0  ;;  %v43_v15 = vld [vmem:[#allocation5 + $0x8] sm:$0xff]  ;;  %v42_v16 = vld [vmem:[#allocation5] sm:$0xff]  ;;  %v41_v17 = vld [vmem:[#allocation2] sm:$0xff] }
  0x20   :  { %189 = vmatpush3.msra.mxu0 %v55_v3  ;;  %v166_v20 = vld [vmem:[%s337_s2] ss:$0 sm:$0xff]  ;;  %s270_s2 = scalar_lea.vmem %s157_s25, 128 }
  0x21   :  { %190 = vmatprep.subr.mxu0 %v300_v0  ;;  %p271_p10 = scmp.ne.s32.totalorder %s157_s25, %s270_s2  ;;  %p276_p12 = scmp.lt.s32.totalorder %s270_s2, %s270_s2 }
  0x22   :  { %191 = vmatpush3.msra.mxu0 %v54_v4 }
  0x23   :  { %192 = vmatprep.subr.mxu0 %v300_v0  ;;  %p277_p13 = por %p276_p12, %p275_p11 }
  0x24   :  { %193 = vmatpush3.msra.mxu0 %v53_v5 }
  0x25   :  { %194 = vmatprep.subr.mxu0 %v300_v0  ;;  %p278_p0 = pnand %p277_p13, %p271_p10 }
  0x26   :  { %195 = vmatpush3.msra.mxu0 %v52_v6 }
  0x27   :  { %196 = vmatprep.subr.mxu0 %v300_v0 }
  0x28   :  { %197 = vmatpush3.msra.mxu0 %v51_v7 }
  0x29   :  { %198 = vmatprep.subr.mxu0 %v300_v0 }
  0x2a   :  { %199 = vmatpush3.msra.mxu0 %v50_v8 }
  0x2b   :  { %200 = vmatprep.subr.mxu0 %v300_v0 }
  0x2c   :  { %201 = vmatpush3.msra.mxu0 %v49_v9 }
  0x2d   :  { %202 = vmatprep.subr.mxu0 %v300_v0 }
  0x2e   :  { %203 = vmatpush3.msra.mxu0 %v48_v10 }
  0x2f   :  { %204 = vmatprep.subr.mxu0 %v300_v0 }
  0x30   :  { %205 = vmatpush3.msra.mxu0 %v47_v11 }
  0x31   :  { %206 = vmatprep.subr.mxu0 %v300_v0 }
  0x32   :  { %207 = vmatpush3.msra.mxu0 %v46_v12 }
  0x33   :  { %208 = vmatprep.subr.mxu0 %v300_v0 }
  0x34   :  { %209 = vmatpush3.msra.mxu0 %v45_v13 }
  0x35   :  { %210 = vmatprep.subr.mxu0 %v300_v0 }
  0x36   :  { %211 = vmatpush3.msra.mxu0 %v44_v14 }
  0x37   :  { %212 = vmatprep.subr.mxu0 %v300_v0 }
  0x38   :  { %213 = vmatpush3.msra.mxu0 %v43_v15 }
  0x39   :  { %214 = vmatprep.subr.mxu0 %v300_v0 }
  0x3a   :  { %215 = vmatpush3.msra.mxu0 %v42_v16 }
  0x3b   :  { %217 = vmatmul.mubr.f32.vlgmr.msra.gmra.mxu0 %v41_v17 }
  0xfb   :  { %v131_v21 = vpop.f32.mrf.mxu0 }
  0xfc   :  { %v132_v22 = vadd.f32 %v166_v20, %v131_v21 }
  0xfd   :  { %v218_v23 = vpop.f32.mrf.mxu0 }
  0xfe   :  { %v138_v24 = vsel %vm137_vm1, %v132_v22, -1e+30 }
  0xff   :  { %139 = vmax.xlane.f32.xlu0 %v138_v24 }
 0x188   :  { %v140_v25 = vpop.xlane.xlu0 %139 }
 0x189   :  { %v141_v26 = vsub.f32 %v138_v24, %v140_v25 }
 0x18b   :  { %v142_v27 = vmul.f32 1.442695, %v141_v26 }
 0x18d   :  { %226 = vpow2.f32 %v142_v27 }
 0x19a   :  { %v227_v28 = vpop.eup %226 }
 0x19b   :  { %v144_v29 = vsel %vm137_vm1, %v227_v28, 0.0 }
 0x19c   :  { %145 = vadd.xlane.f32.xlu0 %v144_v29 }
 0x225   :  { %v146_v30 = vpop.xlane.xlu0 %145 }
 0x226   :  { %228 = vrcp.f32 %v146_v30 }
 0x233   :  { %v229_v31 = vpop.eup %228 }
 0x234   :  { %v148_v32 = vmul.f32 %v229_v31, %v144_v29 }
 0x236   :  { %149 = vst [vmem:[#allocation7] sm:$0xff] %v148_v32 }
 0x237   :  { %281 = shalt.err (!%p278_p0)
}
 0x238   :  { %159 = dma.vmem_to_hbm [thread:$0]  %s157_s25, 128, %s338_s3, [#allocation4]  }
 0x239   :  { %294 = dma.done.wait [#allocation4], 128  }
 0x23a   :  { %295 = vsyncadd [#allocation4], 4294967168 }
 0x23b   :  { %163 = vsyncpa [#allocation3], 1 }
 0x23c   :  { %164 = vsyncpa [#allocation6], 1 }
 0x23d   :  { %165 = vsyncpa [#allocation4], 1 }

</bundles_post_ra>
